<compile_context>
chip_gen: v5e
topology: v5e:2x2
jax: 0.10.0
libtpu: 0.0.40
codegen_flags: <defaults>
</compile_context>

<pallas_src>
import functools

import jax
import jax.numpy as jnp
from jax.experimental import pallas as pl
from jax.experimental.pallas import tpu as pltpu


# ----------------------------------------------------------------------------
# Pallas kernel: out = ci * (A @ Xw)  or  out = ci * (A.T @ Xw)
# Grid: (dst tiles, src tiles); src axis is the reduction axis ("arbitrary").
# Xw is already cj-prescaled (done once in the wrapper), so the kernel is a
# pure MXU streaming reduction that accumulates straight into the f32 output.
# ----------------------------------------------------------------------------
def _lgc_kernel(a_ref, xw_ref, ci_ref, o_ref, *, transposed):
    k = pl.program_id(1)

    @pl.when(k == 0)
    def _():
        o_ref[...] = jnp.zeros_like(o_ref)

    if transposed:
        # a_ref tile is (tk, tm): contract its FIRST axis against xw's rows,
        # i.e. (A tile)^T @ Xw, with the transpose folded into the MXU feed.
        # No HBM-materialized A.T anywhere.
        part = jax.lax.dot_general(
            a_ref[...], xw_ref[...],
            dimension_numbers=(((0,), (0,)), ((), ())),
            preferred_element_type=jnp.float32)
    else:
        part = jnp.dot(a_ref[...], xw_ref[...],
                       preferred_element_type=jnp.float32)

    o_ref[...] += part

    @pl.when(k == pl.num_programs(1) - 1)
    def _():
        # Apply the destination norm once at the end of the reduction.
        o_ref[...] = o_ref[...] * ci_ref[...]


def _round_up(n, m):
    return ((n + m - 1) // m) * m


@functools.partial(jax.jit, static_argnames=("transpose_adj", "tm", "tk"))
def light_graph_conv(adj, xw, ci, *, transpose_adj=False, tm=256, tk=512):
    """One LightGraphConv: out = ci * (A @ Xw) (or A.T @ Xw, without making A.T).

    adj : [R, C] dense 0/1 adjacency (bf16; exact for 0/1 entries)
          transpose_adj=False : dst = rows (R), src = cols (C)
          transpose_adj=True  : dst = cols (C), src = rows (R)
    xw  : [n_src, d]  cj-prescaled source features (bf16)
    ci  : [n_dst, 1]  destination norm deg ** -0.5 (f32)
    returns [n_dst, d] float32
    """
    assert tm % 128 == 0 and tk % 128 == 0, "tiles must be multiples of 128"
    R, C = adj.shape
    n_dst, n_src = (C, R) if transpose_adj else (R, C)
    d = xw.shape[1]

    # Cap tiles for small inputs (keeps padding modest), keep 128-multiples so
    # both orientations of the A tile satisfy the (8, 128) layout constraint.
    tm = min(tm, _round_up(n_dst, 128))
    tk = min(tk, _round_up(n_src, 128))
    pd_dst = _round_up(n_dst, tm)
    pd_src = _round_up(n_src, tk)

    # Zero-pad to tile multiples (padded edges contribute nothing; padded dst
    # rows are sliced off at the end).
    if transpose_adj:
        adj_p = jnp.pad(adj, ((0, pd_src - R), (0, pd_dst - C)))
        a_spec = pl.BlockSpec((tk, tm), lambda i, k: (k, i))
    else:
        adj_p = jnp.pad(adj, ((0, pd_dst - R), (0, pd_src - C)))
        a_spec = pl.BlockSpec((tm, tk), lambda i, k: (i, k))
    xw_p = jnp.pad(xw, ((0, pd_src - n_src), (0, 0)))
    ci_p = jnp.pad(ci, ((0, pd_dst - n_dst), (0, 0)))

    grid = (pd_dst // tm, pd_src // tk)
    # TODO(synk): for very large feature dims (d*tk bf16 + d*tm f32 blowing the
    # VMEM budget, esp. v7x 64 MiB), additionally tile the feature dimension.
    out = pl.pallas_call(
        functools.partial(_lgc_kernel, transposed=transpose_adj),
        out_shape=jax.ShapeDtypeStruct((pd_dst, d), jnp.float32),
        grid_spec=pltpu.PrefetchScalarGridSpec(
            num_scalar_prefetch=0,
            grid=grid,
            in_specs=[
                a_spec,                                        # adjacency tile (bf16)
                pl.BlockSpec((tk, d), lambda i, k: (k, 0)),    # prescaled src feats (bf16)
                pl.BlockSpec((tm, 1), lambda i, k: (i, 0)),    # ci (dst norm, f32)
            ],
            out_specs=pl.BlockSpec((tm, d), lambda i, k: (i, 0)),
        ),
        compiler_params=pltpu.CompilerParams(
            dimension_semantics=("parallel", "arbitrary"),
            vmem_limit_bytes=32 * 1024 * 1024),
    )(adj_p, xw_p, ci_p)
    return out[:n_dst]


# ----------------------------------------------------------------------------
# lightgraphconvlayer.forward (eval mode)
# ----------------------------------------------------------------------------
def _inv_sqrt_deg(deg):
    deg = jnp.where(deg > 0, deg, 1.0)
    return deg ** -0.5


def lightgraphconvlayer_forward(adj_gene_cell, c_feat, g_feat,
                                alpha=None, adj_gene_gene=None,
                                tm=256, tk=512):
    """Dense-graph equivalent of lightgraphconvlayer.forward.

    adj_gene_cell : [n_genes, n_cells] bipartite adjacency for etype 'exp'
                    (cell -> gene); its transpose is 'reverse-exp' (never
                    materialized in HBM).
    adj_gene_gene : [n_genes, n_genes] adjacency for 'co-exp' (only if alpha).
    """
    adj_f32 = adj_gene_cell.astype(jnp.float32)

    # Degree-based normalizers (deg ** -0.5), computed in f32 (exact counts).
    # NOTE: for a static graph these (and the bf16 adjacency) should be cached
    # across forward calls instead of recomputed each time.
    deg_gene = adj_f32.sum(axis=1, keepdims=True)          # degree of genes over 'exp'/'reverse-exp'
    deg_cell = adj_f32.sum(axis=0)[:, None]                # degree of cells over 'exp'/'reverse-exp'
    ci_gene = _inv_sqrt_deg(deg_gene)                      # dst norm, 'exp'        (graph.dstdata['ci'])
    cj_cell = _inv_sqrt_deg(deg_cell)                      # src norm, 'exp'        (graph.srcdata['cj'])
    ci_cell = cj_cell                                      # dst norm, 'reverse-exp'
    cj_gene = ci_gene                                      # src norm, 'reverse-exp'

    # 0/1 adjacency is exact in bf16; halves the dominant HBM stream.
    adj_bf16 = adj_f32.astype(jnp.bfloat16)

    # Pre-scale features by cj ONCE (single pass over [n_src, d]); carry bf16
    # straight into the MXU (f32 accumulation inside the kernel).
    cw = (c_feat.astype(jnp.float32) * cj_cell).astype(jnp.bfloat16)
    gw = (g_feat.astype(jnp.float32) * cj_gene).astype(jnp.bfloat16)

    # 'exp' : cell -> gene
    gene_from_cell = light_graph_conv(adj_bf16, cw, ci_gene,
                                      transpose_adj=False, tm=tm, tk=tk)
    # 'reverse-exp' : gene -> cell  (uses the SAME adjacency buffer, transposed
    # tile-by-tile inside the kernel's index_map / dot_general)
    cell_from_gene = light_graph_conv(adj_bf16, gw, ci_cell,
                                      transpose_adj=True, tm=tm, tk=tk)

    # HeteroGraphConv(aggregate='stack') then .squeeze() / alpha-combine.
    c_out = cell_from_gene                                 # out['cell'].squeeze()
    if alpha is None:
        g_out = gene_from_cell                             # out['gene'].squeeze()
    else:
        assert adj_gene_gene is not None
        agg_f32 = adj_gene_gene.astype(jnp.float32)
        cii = _inv_sqrt_deg(agg_f32.sum(axis=1, keepdims=True))   # graph.dstdata['cii']
        cjj = _inv_sqrt_deg(agg_f32.sum(axis=0)[:, None])         # graph.srcdata['cjj']
        gww = (g_feat.astype(jnp.float32) * cjj).astype(jnp.bfloat16)
        gene_from_gene = light_graph_conv(agg_f32.astype(jnp.bfloat16), gww, cii,
                                          transpose_adj=False, tm=tm, tk=tk)
        # Stack order assumption: slot 0 = 'exp' (cell msg), slot 1 = 'co-exp'.
        g_out = alpha * gene_from_cell + (1.0 - alpha) * gene_from_gene
    return c_out, g_out


# ----------------------------------------------------------------------------
# Pure-JAX reference for correctness checking (same bf16 rounding of inputs,
# full-precision f32 matmul).
# ----------------------------------------------------------------------------
def _ref_matmul(a, b):
    return jnp.dot(a, b, precision=jax.lax.Precision.HIGHEST)


if __name__ == "__main__":
    key = jax.random.PRNGKey(0)
    k_adj, k_agg, k_c, k_g = jax.random.split(key, 4)

    # Small, non-tile-multiple shapes to also exercise the padding path.
    n_cells, n_genes, d = 96, 300, 128

    adj_gene_cell = (jax.random.uniform(k_adj, (n_genes, n_cells)) < 0.1
                     ).astype(jnp.float32)
    adj_gene_gene = (jax.random.uniform(k_agg, (n_genes, n_genes)) < 0.05
                     ).astype(jnp.float32)
    c_feat = jax.random.normal(k_c, (n_cells, d), dtype=jnp.float32)
    g_feat = jax.random.normal(k_g, (n_genes, d), dtype=jnp.float32)

    # ---- shared normalizers / bf16-rounded weighted features for references ----
    deg_gene = adj_gene_cell.sum(axis=1, keepdims=True)
    deg_cell = adj_gene_cell.sum(axis=0)[:, None]
    ci_gene = _inv_sqrt_deg(deg_gene)       # dst norm for 'exp'
    cj_cell = _inv_sqrt_deg(deg_cell)       # src norm for 'exp'
    ci_cell = cj_cell                       # dst norm for 'reverse-exp'
    cj_gene = ci_gene                       # src norm for 'reverse-exp'
    cw = (c_feat * cj_cell).astype(jnp.bfloat16).astype(jnp.float32)
    gw = (g_feat * cj_gene).astype(jnp.bfloat16).astype(jnp.float32)
    g_ref = ci_gene * _ref_matmul(adj_gene_cell, cw)          # 'exp'
    c_ref = ci_cell * _ref_matmul(adj_gene_cell.T, gw)        # 'reverse-exp'

    # ---- alpha = None path (module default) ----
    c_out, g_out = lightgraphconvlayer_forward(adj_gene_cell, c_feat, g_feat,
                                               alpha=None)
    jax.block_until_ready((c_out, g_out))
    assert c_out.shape == (n_cells, d) and g_out.shape == (n_genes, d)
    assert jnp.allclose(g_out, g_ref, rtol=1e-3, atol=1e-3)
    assert jnp.allclose(c_out, c_ref, rtol=1e-3, atol=1e-3)

    # ---- alpha path (adds 'co-exp' gene->gene messages) ----
    alpha = 0.7
    c_out_a, g_out_a = lightgraphconvlayer_forward(
        adj_gene_cell, c_feat, g_feat, alpha=alpha, adj_gene_gene=adj_gene_gene)
    jax.block_until_ready((c_out_a, g_out_a))
    cii = _inv_sqrt_deg(adj_gene_gene.sum(axis=1, keepdims=True))
    cjj = _inv_sqrt_deg(adj_gene_gene.sum(axis=0)[:, None])
    gww = (g_feat * cjj).astype(jnp.bfloat16).astype(jnp.float32)
    gg_ref = cii * _ref_matmul(adj_gene_gene, gww)
    g_ref_a = alpha * g_ref + (1.0 - alpha) * gg_ref
    assert c_out_a.shape == (n_cells, d) and g_out_a.shape == (n_genes, d)
    assert jnp.allclose(c_out_a, c_ref, rtol=1e-3, atol=1e-3)
    assert jnp.allclose(g_out_a, g_ref_a, rtol=1e-3, atol=1e-3)

    print("KERNEL_OK")
</pallas_src>

<mosaic_0001>
module attributes {stable_mosaic.version = 11 : i64} {
  func.func @_lgc_kernel(%arg0: i32, %arg1: i32, %arg2: memref<256x128xbf16, #tpu.memory_space<vmem>>, %arg3: memref<128x128xbf16, #tpu.memory_space<vmem>>, %arg4: memref<256x1xf32, #tpu.memory_space<vmem>>, %arg5: memref<256x128xf32, #tpu.memory_space<vmem>>) attributes {dimension_semantics = [#tpu.dimension_semantics<parallel>, #tpu.dimension_semantics<arbitrary>], iteration_bounds = array<i64: 2, 1>, scalar_prefetch = 0 : i64, scratch_operands = 0 : i64, tpu.core_type = #tpu.core_type<tc>, window_params = [{transform_indices = @transform_0, window_bounds = array<i64: 256, 128>}, {transform_indices = @transform_1, window_bounds = array<i64: 128, 128>}, {transform_indices = @transform_2, window_bounds = array<i64: 256, 1>}, {transform_indices = @transform_3, window_bounds = array<i64: 256, 128>}]} {
    %c0_i32 = arith.constant 0 : i32
    %0 = arith.cmpi eq, %arg1, %c0_i32 : i32
    %1 = arith.extui %0 : i1 to i32
    %c0_i32_0 = arith.constant 0 : i32
    %2 = arith.cmpi ne, %1, %c0_i32_0 : i32
    scf.if %2 {
      %cst_10 = arith.constant 0.000000e+00 : f32
      %12 = vector.broadcast %cst_10 : f32 to vector<256x128xf32>
      %c0_11 = arith.constant 0 : index
      %c0_12 = arith.constant 0 : index
      %13 = vector.load %arg5[%c0_11, %c0_12] : memref<256x128xf32, #tpu.memory_space<vmem>>, vector<256x128xf32>
      tpu.vector_store %arg5[%c0_11, %c0_12], %12 {strides = array<i32>} : memref<256x128xf32, #tpu.memory_space<vmem>>, vector<256x128xf32>,
    } else {
    }
    %c0 = arith.constant 0 : index
    %c0_1 = arith.constant 0 : index
    %3 = vector.load %arg2[%c0, %c0_1] : memref<256x128xbf16, #tpu.memory_space<vmem>>, vector<256x128xbf16>
    %c0_2 = arith.constant 0 : index
    %c0_3 = arith.constant 0 : index
    %4 = vector.load %arg3[%c0_2, %c0_3] : memref<128x128xbf16, #tpu.memory_space<vmem>>, vector<128x128xbf16>
    %cst = arith.constant dense<0.000000e+00> : vector<256x128xf32>
    %5 = tpu.matmul %3, %4, %cst {dimension_numbers = #tpu.dot_dimension_numbers<[1], [0], [0], [1], [0, 0, 1, 1], [], []>} : vector<256x128xbf16>, vector<128x128xbf16>, vector<256x128xf32> -> vector<256x128xf32>
    %c0_4 = arith.constant 0 : index
    %c0_5 = arith.constant 0 : index
    %6 = vector.load %arg5[%c0_4, %c0_5] : memref<256x128xf32, #tpu.memory_space<vmem>>, vector<256x128xf32>
    %7 = arith.addf %6, %5 : vector<256x128xf32>
    %c0_6 = arith.constant 0 : index
    %c0_7 = arith.constant 0 : index
    %8 = vector.load %arg5[%c0_6, %c0_7] : memref<256x128xf32, #tpu.memory_space<vmem>>, vector<256x128xf32>
    tpu.vector_store %arg5[%c0_6, %c0_7], %7 {strides = array<i32>} : memref<256x128xf32, #tpu.memory_space<vmem>>, vector<256x128xf32>,
    %c0_i32_8 = arith.constant 0 : i32
    %9 = arith.cmpi eq, %arg1, %c0_i32_8 : i32
    %10 = arith.extui %9 : i1 to i32
    %c0_i32_9 = arith.constant 0 : i32
    %11 = arith.cmpi ne, %10, %c0_i32_9 : i32
    scf.if %11 {
      %c0_10 = arith.constant 0 : index
      %c0_11 = arith.constant 0 : index
      %12 = vector.load %arg5[%c0_10, %c0_11] : memref<256x128xf32, #tpu.memory_space<vmem>>, vector<256x128xf32>
      %c0_12 = arith.constant 0 : index
      %c0_13 = arith.constant 0 : index
      %13 = vector.load %arg4[%c0_12, %c0_13] : memref<256x1xf32, #tpu.memory_space<vmem>>, vector<256x1xf32>
      %14 = vector.broadcast %13 : vector<256x1xf32> to vector<256x128xf32>
      %15 = arith.mulf %12, %14 : vector<256x128xf32>
      %c0_14 = arith.constant 0 : index
      %c0_15 = arith.constant 0 : index
      %16 = vector.load %arg5[%c0_14, %c0_15] : memref<256x128xf32, #tpu.memory_space<vmem>>, vector<256x128xf32>
      tpu.vector_store %arg5[%c0_14, %c0_15], %15 {strides = array<i32>} : memref<256x128xf32, #tpu.memory_space<vmem>>, vector<256x128xf32>,
    } else {
    }
    return
  }
  func.func @transform_0(%arg0: i32, %arg1: i32) -> (i32, i32) {
    %c0_i32 = arith.constant 0 : i32
    return %arg0, %arg1 : i32, i32
  }
  func.func @transform_1(%arg0: i32, %arg1: i32) -> (i32, i32) {
    %c0_i32 = arith.constant 0 : i32
    %c0_i32_0 = arith.constant 0 : i32
    return %arg1, %c0_i32 : i32, i32
  }
  func.func @transform_2(%arg0: i32, %arg1: i32) -> (i32, i32) {
    %c0_i32 = arith.constant 0 : i32
    %c0_i32_0 = arith.constant 0 : i32
    return %arg0, %c0_i32 : i32, i32
  }
  func.func @transform_3(%arg0: i32, %arg1: i32) -> (i32, i32) {
    %c0_i32 = arith.constant 0 : i32
    %c0_i32_0 = arith.constant 0 : i32
    return %arg0, %c0_i32 : i32, i32
  }
}

</mosaic_0001>

<bundles_post_ra>
// kernel: light_graph_conv.1
= control target key start
LH: loop header
LB: loop body
LE: loop exit
PB: predicated region body
PF: predicated region fallthrough
CT: control target
= control target key end

     0   :  { %s1272_s12 = smov 0   ;;  %s1274_s13 = smov 0   ;;  %s1456_s0 = inlined_call_operand.vmem [shape: bf16[512,128], index: 0, kind: input, shape index: {}]   ;;  %s1457_s1 = inlined_call_operand.vmem [shape: bf16[128,128], index: 1, kind: input, shape index: {}]   ;;  %s1458_s2 = inlined_call_operand.vmem [shape: f32[512,1], index: 2, kind: input, shape index: {}]   ;;  %s1459_s3 = inlined_call_operand.vmem [shape: f32[512,128], index: 3, kind: output, shape index: {}]  }
   0x1   :  { %s1276_s14 = smov 0  }
   0x2 LB: > { %s25_s15 = sadd.s32 1, %s1245_s13  ;;  %p1045_p0 = scmp.ge.s32.totalorder %s1249_s14, 1  ;;  %s1249_s14 = sphi %s1276_s14, %s13_s14   ;;  %s1245_s13 = sphi %s1274_s13, %s1461_s13   ;;  %s1241_s12 = sphi %s1272_s12, %s1460_s12  }
   0x3   : > { %p27_p1 = scmp.ge.s32.totalorder %s25_s15, 2  ;;  %p177_p2 = scmp.lt.s32.totalorder %s1249_s14, 3 }
   0x5   : > { %s1463_s15 = smov (%p27_p1, %s25_s15), 0  ;;  %p178_p3 = pnand %p1045_p0, %p177_p2 }
   0x6   : > { %s1046_s18 = sshll.u32 (!%p178_p3), %s1241_s12, 5 }
   0x7   : > { %181 = sbr.rel (%p178_p3) target bundleno = 238 (0xee), region = 32  ;;  %p215_p4 = scmp.lt.s32.totalorder (!%p178_p3), %s1046_s18, 63 }
   0xc   : > { %v1173_v0 = vld [vmem:[%s1457_s1 + $0x38] sm:$0xff]  ;;  %v1251_v1 = vmov 0   ;;  %v1172_v2 = vld [vmem:[%s1457_s1 + $0x30] sm:$0xff]  ;;  %s1465_s18 = smov (!%p215_p4, %s1046_s18), 63  ;;  %v1171_v3 = vld [vmem:[%s1457_s1 + $0x28] sm:$0xff] }
   0xd   : > { %1226 = vset.pattern.permute.xlu2 %v1251_v1  ;;  %1225 = vset.pattern.permute.xlu1 %v1251_v1  ;;  %s1049_s21 = sshll.u32 %s1465_s18, 3  ;;  %v1170_v7 = vld [vmem:[%s1457_s1 + $0x20] sm:$0xff]  ;;  %v1169_v11 = vld [vmem:[%s1457_s1 + $0x18] sm:$0xff]  ;;  %v1168_v12 = vld [vmem:[%s1457_s1 + $0x10] sm:$0xff]  ;;  %s1047_s8 = sshll.u32 %s1465_s18, 2 }
   0xe   : > { %469 = vmatpush.bf16.msra.mxu0 %v1173_v0  ;;  %1174 = vmatpush.bf16.msra.mxu1 %v1173_v0  ;;  %s1304_s24 = scalar_lea.vmem %s1458_s2, %s1049_s21  ;;  %v1167_v16 = vld [vmem:[%s1457_s1 + $0x8] sm:$0xff]  ;;  %v1166_v17 = vld [vmem:[%s1457_s1] sm:$0xff]  ;;  %s1337_s16 = scalar_lea.vmem %s1456_s0, %s1047_s8 }
   0xf   : > { %1175 = vmatpush.bf16.msra.mxu2 %v1173_v0  ;;  %1176 = vmatpush.bf16.msra.mxu3 %v1173_v0  ;;  %v693_v4 = vld [vmem:[%s1304_s24 + $0x20] sm:$0xff]  ;;  %v691_v5 = vld [vmem:[%s1304_s24 + $0x10] sm:$0xff]  ;;  %v694_v8 = vld [vmem:[%s1304_s24 + $0x28] sm:$0xff]  ;;  %s1395_s20 = scalar_lea.vmem %s1459_s3, %s1049_s21 }
  0x10   : > { %1224 = vset.pattern.permute.xlu0 %v1251_v1  ;;  %v689_v6 = vld [vmem:[%s1304_s24] sm:$0xff]  ;;  %743 = vperm.xlu2 %1226, %v693_v4   ;;  %v692_v9 = vld [vmem:[%s1304_s24 + $0x18] sm:$0xff]  ;;  %v690_v10 = vld [vmem:[%s1304_s24 + $0x8] sm:$0xff] }
  0x11   : > { %733 = vperm.xlu1 %1225, %v691_v5   ;;  %723 = vperm.xlu0 %1224, %v689_v6   ;;  %v697_v13 = vld [vmem:[%s1304_s24 + $0x40] sm:$0xff]  ;;  %v696_v14 = vld [vmem:[%s1304_s24 + $0x38] sm:$0xff]  ;;  %v695_v15 = vld [vmem:[%s1304_s24 + $0x30] sm:$0xff] }
  0x12   : > { %470 = vmatpush.bf16.msra.mxu0 %v1172_v2  ;;  %1177 = vmatpush.bf16.msra.mxu1 %v1172_v2  ;;  %v700_v18 = vld [vmem:[%s1304_s24 + $0x58] sm:$0xff]  ;;  %v699_v19 = vld [vmem:[%s1304_s24 + $0x50] sm:$0xff]  ;;  %v1150_v20 = vld [vmem:[%s1337_s16] sm:$0xff] }
  0x13   : > { %1178 = vmatpush.bf16.msra.mxu2 %v1172_v2  ;;  %1179 = vmatpush.bf16.msra.mxu3 %v1172_v2  ;;  %v698_v21 = vld [vmem:[%s1304_s24 + $0x48] sm:$0xff]  ;;  %v1154_v22 = vld [vmem:[%s1337_s16 + $0x20] sm:$0xff]  ;;  %v703_v25 = vld [vmem:[%s1304_s24 + $0x70] sm:$0xff] }
  0x14   : > { %v1158_v23 = vld [vmem:[%s1337_s16 + $0x40] sm:$0xff]  ;;  %v702_v26 = vld [vmem:[%s1304_s24 + $0x68] sm:$0xff]  ;;  %v704_v31 = vld [vmem:[%s1304_s24 + $0x78] sm:$0xff] }
  0x15   : > { %v1162_v24 = vld [vmem:[%s1337_s16 + $0x60] sm:$0xff]  ;;  %v706_v28 = vld [vmem:[%s1304_s24 + $0x88] sm:$0xff]  ;;  %v708_v36 = vld [vmem:[%s1304_s24 + $0x98] sm:$0xff] }
  0x16   : > { %471 = vmatpush.bf16.msra.mxu0 %v1171_v3  ;;  %1180 = vmatpush.bf16.msra.mxu1 %v1171_v3  ;;  %v701_v27 = vld [vmem:[%s1304_s24 + $0x60] sm:$0xff]  ;;  %v1151_v30 = vld [vmem:[%s1337_s16 + $0x8] sm:$0xff]  ;;  %v707_v37 = vld [vmem:[%s1304_s24 + $0x90] sm:$0xff] }
  0x17   : > { %1181 = vmatpush.bf16.msra.mxu2 %v1171_v3  ;;  %1182 = vmatpush.bf16.msra.mxu3 %v1171_v3  ;;  %v705_v29 = vld [vmem:[%s1304_s24 + $0x80] sm:$0xff]  ;;  %v1155_v32 = vld [vmem:[%s1337_s16 + $0x28] sm:$0xff]  ;;  %v712_v38 = vld [vmem:[%s1304_s24 + $0xb8] sm:$0xff] }
  0x18   : > { %748 = vperm.xlu2 %1226, %v694_v8   ;;  %v1159_v33 = vld [vmem:[%s1337_s16 + $0x48] sm:$0xff]  ;;  %v709_v35 = vld [vmem:[%s1304_s24 + $0xa0] sm:$0xff]  ;;  %v711_v39 = vld [vmem:[%s1304_s24 + $0xb0] sm:$0xff] }
  0x19   : > { %738 = vperm.xlu1 %1225, %v692_v9   ;;  %728 = vperm.xlu0 %1224, %v690_v10   ;;  %v1163_v34 = vld [vmem:[%s1337_s16 + $0x68] sm:$0xff]  ;;  %v1152_v40 = vld [vmem:[%s1337_s16 + $0x10] sm:$0xff]  ;;  %v713_v47 = vld [vmem:[%s1304_s24 + $0xc0] sm:$0xff] }
  0x1a   : > { %472 = vmatpush.bf16.msra.mxu0 %v1170_v7  ;;  %1183 = vmatpush.bf16.msra.mxu1 %v1170_v7  ;;  %v710_v41 = vld [vmem:[%s1304_s24 + $0xa8] sm:$0xff]  ;;  %v1156_v42 = vld [vmem:[%s1337_s16 + $0x30] sm:$0xff]  ;;  %v717_v49 = vld [vmem:[%s1304_s24 + $0xe0] sm:$0xff] }
  0x1b   : > { %1184 = vmatpush.bf16.msra.mxu2 %v1170_v7  ;;  %1185 = vmatpush.bf16.msra.mxu3 %v1170_v7  ;;  %v1160_v43 = vld [vmem:[%s1337_s16 + $0x50] sm:$0xff]  ;;  %v714_v46 = vld [vmem:[%s1304_s24 + $0xc8] sm:$0xff]  ;;  %v1153_v50 = vld [vmem:[%s1337_s16 + $0x18] sm:$0xff] }
  0x1c   : > { %v1164_v44 = vld [vmem:[%s1337_s16 + $0x70] sm:$0xff]  ;;  %v718_v48 = vld [vmem:[%s1304_s24 + $0xe8] sm:$0xff]  ;;  %v716_v51 = vld [vmem:[%s1304_s24 + $0xd8] sm:$0xff] }
  0x1d   : > { %v715_v45 = vld [vmem:[%s1304_s24 + $0xd0] sm:$0xff]  ;;  %v1157_v52 = vld [vmem:[%s1337_s16 + $0x38] sm:$0xff] }
  0x1e   : > { %473 = vmatpush.bf16.msra.mxu0 %v1169_v11  ;;  %1186 = vmatpush.bf16.msra.mxu1 %v1169_v11  ;;  %v1161_v53 = vld [vmem:[%s1337_s16 + $0x58] sm:$0xff]  ;;  %v719_v56 = vld [vmem:[%s1304_s24 + $0xf0] sm:$0xff] }
  0x1f   : > { %1187 = vmatpush.bf16.msra.mxu2 %v1169_v11  ;;  %1188 = vmatpush.bf16.msra.mxu3 %v1169_v11  ;;  %v1165_v54 = vld [vmem:[%s1337_s16 + $0x78] sm:$0xff] }
  0x20   : > { %763 = vperm.xlu2 %1226, %v697_v13   ;;  %v720_v55 = vld [vmem:[%s1304_s24 + $0xf8] sm:$0xff] }
  0x21   : > { %758 = vperm.xlu1 %1225, %v696_v14   ;;  %753 = vperm.xlu0 %1224, %v695_v15  }
  0x22   : > { %474 = vmatpush.bf16.msra.mxu0 %v1168_v12  ;;  %1189 = vmatpush.bf16.msra.mxu1 %v1168_v12 }
  0x23   : > { %1190 = vmatpush.bf16.msra.mxu2 %v1168_v12  ;;  %1191 = vmatpush.bf16.msra.mxu3 %v1168_v12 }
  0x26   : > { %475 = vmatpush.bf16.msra.mxu0 %v1167_v16  ;;  %1192 = vmatpush.bf16.msra.mxu1 %v1167_v16 }
  0x27   : > { %1193 = vmatpush.bf16.msra.mxu2 %v1167_v16  ;;  %1194 = vmatpush.bf16.msra.mxu3 %v1167_v16 }
  0x28   : > { %778 = vperm.xlu2 %1226, %v700_v18  }
  0x29   : > { %773 = vperm.xlu1 %1225, %v699_v19   ;;  %768 = vperm.xlu0 %1224, %v698_v21  }
  0x2a   : > { %476 = vmatpush.bf16.msra.mxu0 %v1166_v17  ;;  %1195 = vmatpush.bf16.msra.mxu1 %v1166_v17 }
  0x2b   : > { %1196 = vmatpush.bf16.msra.mxu2 %v1166_v17  ;;  %1197 = vmatpush.bf16.msra.mxu3 %v1166_v17 }
  0x2d   : > { %477 = vmatmul.bf16.vlgmr.msra.gmra.mxu0 %v1150_v20  ;;  %497 = vmatmul.bf16.vlgmr.msra.gmra.mxu1 %v1154_v22 }
  0x2e   : > { %517 = vmatmul.bf16.vlgmr.msra.gmra.mxu2 %v1158_v23  ;;  %537 = vmatmul.bf16.vlgmr.msra.gmra.mxu3 %v1162_v24 }
  0x30   : > { %793 = vperm.xlu2 %1226, %v703_v25  }
  0x31   : > { %788 = vperm.xlu1 %1225, %v702_v26   ;;  %783 = vperm.xlu0 %1224, %v701_v27  }
  0x38   : > { %808 = vperm.xlu2 %1226, %v706_v28  }
  0x39   : > { %803 = vperm.xlu1 %1225, %v705_v29   ;;  %798 = vperm.xlu0 %1224, %v704_v31  }
  0x3d   : > { %482 = vmatmul.bf16.gmra.mxu0 %v1151_v30  ;;  %502 = vmatmul.bf16.gmra.mxu1 %v1155_v32 }
  0x3e   : > { %522 = vmatmul.bf16.gmra.mxu2 %v1159_v33  ;;  %542 = vmatmul.bf16.gmra.mxu3 %v1163_v34 }
  0x40   : > { %823 = vperm.xlu2 %1226, %v709_v35  }
  0x41   : > { %818 = vperm.xlu1 %1225, %v708_v36   ;;  %813 = vperm.xlu0 %1224, %v707_v37  }
  0x48   : > { %838 = vperm.xlu2 %1226, %v712_v38  }
  0x49   : > { %833 = vperm.xlu1 %1225, %v711_v39   ;;  %828 = vperm.xlu0 %1224, %v710_v41  }
  0x4d   : > { %487 = vmatmul.bf16.gmra.mxu0 %v1152_v40  ;;  %507 = vmatmul.bf16.gmra.mxu1 %v1156_v42 }
  0x4e   : > { %527 = vmatmul.bf16.gmra.mxu2 %v1160_v43  ;;  %547 = vmatmul.bf16.gmra.mxu3 %v1164_v44 }
  0x50   : > { %853 = vperm.xlu2 %1226, %v715_v45  }
  0x51   : > { %848 = vperm.xlu1 %1225, %v714_v46   ;;  %843 = vperm.xlu0 %1224, %v713_v47  }
  0x58   : > { %868 = vperm.xlu2 %1226, %v718_v48  }
  0x59   : > { %863 = vperm.xlu1 %1225, %v717_v49   ;;  %858 = vperm.xlu0 %1224, %v716_v51  }
  0x5d   : > { %492 = vmatmul.bf16.gmra.mxu0 %v1153_v50  ;;  %512 = vmatmul.bf16.gmra.mxu1 %v1157_v52 }
  0x5e   : > { %532 = vmatmul.bf16.gmra.mxu2 %v1161_v53  ;;  %552 = vmatmul.bf16.gmra.mxu3 %v1165_v54 }
  0x61   : > { %878 = vperm.xlu1 %1225, %v720_v55   ;;  %873 = vperm.xlu0 %1224, %v719_v56  }
  0x6a   : > { %v1378_v57 = vpop.permute.xlu2 %743 }
  0x72   : > { %v1380_v58 = vpop.permute.xlu2 %748 }
  0x7a   : > { %v764_v60 = vpop.permute.xlu2 %763 }
  0x82   : > { %v779_v0 = vpop.permute.xlu2 %778 }
  0x83   : > { %v734_v59 = vpop.permute.xlu1 %733  ;;  %v724_v61 = vpop.permute.xlu0 %723 }
  0x8a   : > { %v1386_v3 = vpop.permute.xlu2 %793 }
  0x8b   : > { %v739_v62 = vpop.permute.xlu1 %738  ;;  %v729_v63 = vpop.permute.xlu0 %728 }
  0x92   : > { %v809_v6 = vpop.permute.xlu2 %808 }
  0x93   : > { %v1382_v1 = vpop.permute.xlu1 %758  ;;  %v1384_v2 = vpop.permute.xlu0 %753 }
  0x9a   : > { %v1397_v14 = vpop.permute.xlu2 %823 }
  0x9b   : > { %v774_v4 = vpop.permute.xlu1 %773  ;;  %v769_v5 = vpop.permute.xlu0 %768 }
  0xa2   : > { %v1406_v25 = vpop.permute.xlu2 %838 }
  0xa3   : > { %v1388_v7 = vpop.permute.xlu1 %788  ;;  %v784_v8 = vpop.permute.xlu0 %783 }
  0xaa   : > { %v478_v9 = vpop.f32.mrf.mxu0  ;;  %v498_v10 = vpop.f32.mrf.mxu1 }
  0xab   : > { %v881_v11 = vmul.f32 %v724_v61, %v478_v9  ;;  %v889_v12 = vmul.f32 %v764_v60, %v498_v10  ;;  %v804_v13 = vpop.permute.xlu1 %803  ;;  %v1400_v15 = vpop.permute.xlu0 %798 }
  0xac   : > { %v854_v39 = vpop.permute.xlu2 %853 }
  0xad   : > { %913 = vst [vmem:[%s1395_s20] sm:$0xff] %v881_v11 }
  0xae   : > { %921 = vst [vmem:[%s1395_s20 + $0x40] sm:$0xff] %v889_v12 }
  0xb1   : > { %v518_v16 = vpop.f32.mrf.mxu2  ;;  %v538_v17 = vpop.f32.mrf.mxu3 }
  0xb2   : > { %v480_v18 = vpop.f32.mrf.mxu0  ;;  %v500_v19 = vpop.f32.mrf.mxu1  ;;  %v897_v20 = vmul.f32 %v804_v13, %v518_v16 }
  0xb3   : > { %v882_v21 = vmul.f32 %v729_v63, %v480_v18  ;;  %v890_v22 = vmul.f32 %v769_v5, %v500_v19  ;;  %v819_v23 = vpop.permute.xlu1 %818  ;;  %v814_v24 = vpop.permute.xlu0 %813 }
  0xb4   : > { %929 = vst [vmem:[%s1395_s20 + $0x80] sm:$0xff] %v897_v20  ;;  %v869_v11 = vpop.permute.xlu2 %868 }
  0xb5   : > { %914 = vst [vmem:[%s1395_s20 + $0x8] sm:$0xff] %v882_v21 }
  0xb6   : > { %922 = vst [vmem:[%s1395_s20 + $0x48] sm:$0xff] %v890_v22 }
  0xb9   : > { %v520_v26 = vpop.f32.mrf.mxu2  ;;  %v540_v27 = vpop.f32.mrf.mxu3 }
  0xba   : > { %v483_v28 = vpop.f32.mrf.mxu0  ;;  %v503_v29 = vpop.f32.mrf.mxu1  ;;  %v898_v30 = vmul.f32 %v809_v6, %v520_v26 }
  0xbb   : > { %v883_v31 = vmul.f32 %v734_v59, %v483_v28  ;;  %v891_v32 = vmul.f32 %v774_v4, %v503_v29  ;;  %v1409_v33 = vpop.permute.xlu1 %833  ;;  %v829_v34 = vpop.permute.xlu0 %828 }
  0xbc   : > { %930 = vst [vmem:[%s1395_s20 + $0x88] sm:$0xff] %v898_v30 }
  0xbd   : > { %915 = vst [vmem:[%s1395_s20 + $0x10] sm:$0xff] %v883_v31 }
  0xbe   : > { %923 = vst [vmem:[%s1395_s20 + $0x50] sm:$0xff] %v891_v32 }
  0xc1   : > { %v523_v35 = vpop.f32.mrf.mxu2  ;;  %v543_v36 = vpop.f32.mrf.mxu3 }
  0xc2   : > { %v485_v37 = vpop.f32.mrf.mxu0  ;;  %v505_v38 = vpop.f32.mrf.mxu1  ;;  %v899_v40 = vmul.f32 %v814_v24, %v523_v35  ;;  %v907_v41 = vmul.f32 %v854_v39, %v543_v36 }
  0xc3   : > { %v884_v42 = vmul.f32 %v739_v62, %v485_v37  ;;  %v892_v43 = vmul.f32 %v779_v0, %v505_v38  ;;  %v849_v44 = vpop.permute.xlu1 %848  ;;  %v844_v46 = vpop.permute.xlu0 %843 }
  0xc4   : > { %931 = vst [vmem:[%s1395_s20 + $0x90] sm:$0xff] %v899_v40  ;;  %v906_v45 = vmul.f32 %v849_v44, %v540_v27  ;;  %v905_v47 = vmul.f32 %v844_v46, %v538_v17 }
  0xc5   : > { %939 = vst [vmem:[%s1395_s20 + $0xd0] sm:$0xff] %v907_v41 }
  0xc6   : > { %916 = vst [vmem:[%s1395_s20 + $0x18] sm:$0xff] %v884_v42 }
  0xc7   : > { %924 = vst [vmem:[%s1395_s20 + $0x58] sm:$0xff] %v892_v43 }
  0xc8   : > { %938 = vst [vmem:[%s1395_s20 + $0xc8] sm:$0xff] %v906_v45 }
  0xc9   : > { %v525_v48 = vpop.f32.mrf.mxu2  ;;  %v545_v49 = vpop.f32.mrf.mxu3  ;;  %937 = vst [vmem:[%s1395_s20 + $0xc0] sm:$0xff] %v905_v47 }
  0xca   : > { %v488_v50 = vpop.f32.mrf.mxu0  ;;  %v508_v51 = vpop.f32.mrf.mxu1  ;;  %v900_v52 = vmul.f32 %v819_v23, %v525_v48 }
  0xcb   : > { %v885_v53 = vmul.f32 %v1378_v57, %v488_v50  ;;  %v893_v54 = vmul.f32 %v784_v8, %v508_v51  ;;  %v859_v55 = vpop.permute.xlu0 %858  ;;  %v864_v63 = vpop.permute.xlu1 %863 }
  0xcc   : > { %932 = vst [vmem:[%s1395_s20 + $0x98] sm:$0xff] %v900_v52  ;;  %v908_v56 = vmul.f32 %v859_v55, %v545_v49 }
  0xcd   : > { %917 = vst [vmem:[%s1395_s20 + $0x20] sm:$0xff] %v885_v53 }
  0xce   : > { %925 = vst [vmem:[%s1395_s20 + $0x60] sm:$0xff] %v893_v54 }
  0xcf   : > { %940 = vst [vmem:[%s1395_s20 + $0xd8] sm:$0xff] %v908_v56 }
  0xd1   : > { %v528_v59 = vpop.f32.mrf.mxu2  ;;  %v548_v60 = vpop.f32.mrf.mxu3 }
  0xd2   : > { %v490_v61 = vpop.f32.mrf.mxu0  ;;  %v510_v62 = vpop.f32.mrf.mxu1  ;;  %v901_v0 = vmul.f32 %v1397_v14, %v528_v59  ;;  %v909_v57 = vmul.f32 %v864_v63, %v548_v60 }
  0xd3   : > { %v886_v4 = vmul.f32 %v1380_v58, %v490_v61  ;;  %v894_v5 = vmul.f32 %v1388_v7, %v510_v62  ;;  %v874_v19 = vpop.permute.xlu0 %873  ;;  %v879_v24 = vpop.permute.xlu1 %878 }
  0xd4   : > { %933 = vst [vmem:[%s1395_s20 + $0xa0] sm:$0xff] %v901_v0 }
  0xd5   : > { %941 = vst [vmem:[%s1395_s20 + $0xe0] sm:$0xff] %v909_v57 }
  0xd6   : > { %918 = vst [vmem:[%s1395_s20 + $0x28] sm:$0xff] %v886_v4 }
  0xd7   : > { %926 = vst [vmem:[%s1395_s20 + $0x68] sm:$0xff] %v894_v5 }
  0xd9   : > { %v530_v6 = vpop.f32.mrf.mxu2  ;;  %v550_v8 = vpop.f32.mrf.mxu3 }
  0xda   : > { %v493_v9 = vpop.f32.mrf.mxu0  ;;  %v513_v10 = vpop.f32.mrf.mxu1  ;;  %v902_v12 = vmul.f32 %v829_v34, %v530_v6  ;;  %v910_v13 = vmul.f32 %v869_v11, %v550_v8 }
  0xdb   : > { %v887_v14 = vmul.f32 %v1384_v2, %v493_v9  ;;  %v895_v58 = vmul.f32 %v1386_v3, %v513_v10 }
  0xdc   : > { %934 = vst [vmem:[%s1395_s20 + $0xa8] sm:$0xff] %v902_v12 }
  0xdd   : > { %942 = vst [vmem:[%s1395_s20 + $0xe8] sm:$0xff] %v910_v13 }
  0xde   : > { %919 = vst [vmem:[%s1395_s20 + $0x30] sm:$0xff] %v887_v14 }
  0xdf   : > { %927 = vst [vmem:[%s1395_s20 + $0x70] sm:$0xff] %v895_v58 }
  0xe1   : > { %v533_v7 = vpop.f32.mrf.mxu2  ;;  %v553_v16 = vpop.f32.mrf.mxu3 }
  0xe2   : > { %v495_v17 = vpop.f32.mrf.mxu0  ;;  %v515_v18 = vpop.f32.mrf.mxu1  ;;  %v903_v20 = vmul.f32 %v1409_v33, %v533_v7  ;;  %v911_v21 = vmul.f32 %v874_v19, %v553_v16 }
  0xe3   : > { %v888_v2 = vmul.f32 %v1382_v1, %v495_v17  ;;  %v896_v22 = vmul.f32 %v1400_v15, %v515_v18 }
  0xe4   : > { %935 = vst [vmem:[%s1395_s20 + $0xb0] sm:$0xff] %v903_v20 }
  0xe5   : > { %943 = vst [vmem:[%s1395_s20 + $0xf0] sm:$0xff] %v911_v21 }
  0xe6   : > { %920 = vst [vmem:[%s1395_s20 + $0x38] sm:$0xff] %v888_v2 }
  0xe7   : > { %928 = vst [vmem:[%s1395_s20 + $0x78] sm:$0xff] %v896_v22 }
  0xe9   : > { %v535_v3 = vpop.f32.mrf.mxu2  ;;  %v555_v23 = vpop.f32.mrf.mxu3 }
  0xea   : > { %v904_v26 = vmul.f32 %v1406_v25, %v535_v3  ;;  %v912_v27 = vmul.f32 %v879_v24, %v555_v23 }
  0xec   : > { %936 = vst [vmem:[%s1395_s20 + $0xb8] sm:$0xff] %v904_v26 }
  0xed   : > { %944 = vst [vmem:[%s1395_s20 + $0xf8] sm:$0xff] %v912_v27 }
  0xee PF: > { %s13_s14 = sadd.s32 1, %s1249_s14   ;;  %s1460_s12 = smov %s1245_s13 }
  0xef   : > { %p10_p5 = scmp.ge.s32.totalorder %s13_s14, 4   ;;  %s1461_s13 = smov %s1463_s15 }
  0xf1   :  { %12 = sbr.rel (!%p10_p5) target bundleno = 2 (0x2), region = 76 }

</bundles_post_ra>
